<compile_context>
chip_gen: v6e
topology: v6e:2x2x1
jax: 0.10.0
libtpu: 0.0.40
codegen_flags: <defaults>
</compile_context>

<pallas_src>
import jax
import jax.numpy as jnp
from jax.experimental import pallas as pl
from jax.experimental.pallas import tpu as pltpu

LANES = 128         # vreg lane width
DEFAULT_TB = 1024   # target sublane-groups per grid step (1024*128 = 131072 rows/step)
                    # v5e/v6e: 512-1024 is at roofline; v7x: ~2048 amortises its
                    # faster HBM (still < 32 MiB default scoped VMEM double-buffered).


def _linear_kernel(w_ref, b_ref, x_ref, o_ref):
    """logits = x @ W^T + b as VPU broadcast-MACs on a lane-dense layout.

    w_ref: (out_f, in_f)    SMEM  (12 scalars, resident across the whole grid)
    b_ref: (out_f,)         SMEM
    x_ref: (in_f, TB, 128)  VMEM block (batch split into TB sublane-groups x 128 lanes)
    o_ref: (out_f, TB, 128) VMEM block (lane-dense output)
    """
    out_f, in_f = w_ref.shape
    for j in range(out_f):
        # Re-read x_ref[k] per output row: VMEM re-loads are free (hidden under
        # the HBM DMA) and keep vreg live ranges short at large TB.
        acc = x_ref[0] * w_ref[j, 0]
        for k in range(1, in_f):
            acc = acc + x_ref[k] * w_ref[j, k]
        o_ref[j] = (acc + b_ref[j]).astype(o_ref.dtype)


def _choose_tile(sub_total, tb_target):
    """Pick (tb, sub_pad) in 128-lane sublane-groups.

    Rules: tb must be a multiple of 8 unless it equals the (padded) full dim;
    keep padding waste <= ~10%; prefer >=2 grid steps (v7x dual-TC) when the
    batch is large enough to split.
    """
    tb_target = max(8, (int(tb_target) // 8) * 8)
    # Cap at ~half the batch (rounded up to a multiple of 8) so big batches get
    # at least two grid steps for the "parallel" axis.
    half8 = (((sub_total + 1) // 2) + 7) // 8 * 8
    t = min(tb_target, half8)
    while t >= 8:
        sub_pad = -(-sub_total // t) * t
        if (sub_pad - sub_total) <= 0.10 * sub_total:
            return t, sub_pad
        t -= 8
    # Fallback (only hit for small batches): one full-extent tile, zero padding.
    return sub_total, sub_total


def _linear_lane_major(x3, weight, bias, tb, out_dtype):
    """x3: (in_f, sub_pad, 128) -> (out_f, sub_pad, 128)."""
    in_f, sub_pad, lanes = x3.shape
    out_f = weight.shape[0]
    grid = (sub_pad // tb,)
    return pl.pallas_call(
        _linear_kernel,
        out_shape=jax.ShapeDtypeStruct((out_f, sub_pad, lanes), out_dtype),
        grid=grid,
        in_specs=[
            # Weight/bias are ~60 bytes: keep them resident in SMEM for the whole
            # grid instead of re-DMAing them every batch tile.
            pl.BlockSpec(memory_space=pltpu.MemorySpace.SMEM),
            pl.BlockSpec(memory_space=pltpu.MemorySpace.SMEM),
            pl.BlockSpec((in_f, tb, lanes), lambda i: (0, i, 0)),
        ],
        out_specs=pl.BlockSpec((out_f, tb, lanes), lambda i: (0, i, 0)),
        compiler_params=pltpu.CompilerParams(
            # Batch tiles are independent: lets v7x shard the grid across both TCs.
            dimension_semantics=("parallel",),
        ),
    )(weight, bias, x3)


def softmax_classifier_forward_feature_major(
    x_fm, weight, bias, *, tb_target=DEFAULT_TB, out_dtype=None
):
    """Fast path: x_fm is feature-major (in_f, n); returns logits as (out_f, n).

    No transposes are introduced -- only contiguous (free) reshapes, so the only
    HBM traffic is the kernel's own streaming.
    """
    in_f, n = x_fm.shape
    out_f = weight.shape[0]
    if out_dtype is None:
        out_dtype = x_fm.dtype

    sub_total = -(-n // LANES)
    tb, sub_pad = _choose_tile(sub_total, tb_target)
    n_pad = sub_pad * LANES
    if n_pad != n:
        x_fm = jnp.pad(x_fm, ((0, 0), (0, n_pad - n)))
    x3 = x_fm.reshape(in_f, sub_pad, LANES)          # contiguous: no data movement

    out3 = _linear_lane_major(x3, weight, bias, tb, out_dtype)

    out_fm = out3.reshape(out_f, n_pad)              # contiguous: no data movement
    return out_fm[:, :n] if n_pad != n else out_fm


def softmax_classifier_forward(x, weight, bias, *, tb_target=DEFAULT_TB, out_dtype=None):
    """Module-parity API: x (n, in_f) -> logits (n, out_f)  (= x @ W.T + b).

    NOTE: the transposes to/from the lane-major kernel layout cost ~2x the
    kernel's own HBM traffic; producers that can keep activations feature-major
    should call softmax_classifier_forward_feature_major instead.
    """
    logits_fm = softmax_classifier_forward_feature_major(
        x.T, weight, bias, tb_target=tb_target, out_dtype=out_dtype
    )
    return logits_fm.T


if __name__ == "__main__":
    key = jax.random.PRNGKey(0)
    kx, kw, kb, kx2, kx3 = jax.random.split(key, 5)

    in_features, out_features = 4, 3

    # Deterministic params, mimicking nn.Linear's uniform(-1/sqrt(in), 1/sqrt(in)).
    bound = 1.0 / jnp.sqrt(jnp.float32(in_features))
    weight = jax.random.uniform(
        kw, (out_features, in_features), jnp.float32, -bound, bound
    )
    bias = jax.random.uniform(kb, (out_features,), jnp.float32, -bound, bound)

    # 1) Small batch, module-parity API (single padded tile).
    batch = 8
    x = jax.random.normal(kx, (batch, in_features), jnp.float32)
    out = jax.block_until_ready(softmax_classifier_forward(x, weight, bias))
    ref = x @ weight.T + bias
    assert out.shape == (batch, out_features)
    assert jnp.allclose(out, ref, atol=1e-5, rtol=1e-5)

    # 2) Mid-size batch: exercises padding control (falls back to a single
    #    zero-padding full-extent tile instead of a 60%-padded tile).
    batch2 = 2560
    x2 = jax.random.normal(kx2, (batch2, in_features), jnp.float32)
    out2 = jax.block_until_ready(softmax_classifier_forward(x2, weight, bias))
    ref2 = x2 @ weight.T + bias
    assert out2.shape == (batch2, out_features)
    assert jnp.allclose(out2, ref2, atol=1e-5, rtol=1e-5)

    # 3) Feature-major fast path (no wrapper transposes), 2-step pipelined grid
    #    so the "parallel" axis / double-buffering are exercised.
    n3 = 4096
    x3 = jax.random.normal(kx3, (in_features, n3), jnp.float32)
    out3 = jax.block_until_ready(
        softmax_classifier_forward_feature_major(x3, weight, bias)
    )
    ref3 = weight @ x3 + bias[:, None]
    assert out3.shape == (out_features, n3)
    assert jnp.allclose(out3, ref3, atol=1e-5, rtol=1e-5)

    print("KERNEL_OK")
</pallas_src>

<mosaic_0001>
module attributes {stable_mosaic.version = 11 : i64} {
  func.func @_linear_kernel(%arg0: i32, %arg1: memref<3x4xf32, #tpu.memory_space<smem>>, %arg2: memref<3xf32, #tpu.memory_space<smem>>, %arg3: memref<4x1x128xf32, #tpu.memory_space<vmem>>, %arg4: memref<3x1x128xf32, #tpu.memory_space<vmem>>) attributes {dimension_semantics = [#tpu.dimension_semantics<parallel>], iteration_bounds = array<i64: 1>, scalar_prefetch = 0 : i64, scratch_operands = 0 : i64, tpu.core_type = #tpu.core_type<tc>, window_params = [{transform_indices = @transform_0, window_bounds = array<i64: 3, 4>}, {transform_indices = @transform_1, window_bounds = array<i64: 3>}, {transform_indices = @transform_2, window_bounds = array<i64: 4, 1, 128>}, {transform_indices = @transform_3, window_bounds = array<i64: 3, 1, 128>}]} {
    %c0 = arith.constant 0 : index
    %c0_0 = arith.constant 0 : index
    %c0_1 = arith.constant 0 : index
    %0 = vector.load %arg3[%c0, %c0_0, %c0_1] : memref<4x1x128xf32, #tpu.memory_space<vmem>>, vector<1x1x128xf32>
    %1 = vector.shape_cast %0 : vector<1x1x128xf32> to vector<1x128xf32>
    %c0_2 = arith.constant 0 : index
    %c0_3 = arith.constant 0 : index
    %2 = memref.load %arg1[%c0_2, %c0_3] : memref<3x4xf32, #tpu.memory_space<smem>>
    %3 = vector.broadcast %2 : f32 to vector<1x128xf32>
    %4 = arith.mulf %1, %3 : vector<1x128xf32>
    %c1 = arith.constant 1 : index
    %c0_4 = arith.constant 0 : index
    %c0_5 = arith.constant 0 : index
    %5 = vector.load %arg3[%c1, %c0_4, %c0_5] : memref<4x1x128xf32, #tpu.memory_space<vmem>>, vector<1x1x128xf32>
    %6 = vector.shape_cast %5 : vector<1x1x128xf32> to vector<1x128xf32>
    %c0_6 = arith.constant 0 : index
    %c1_7 = arith.constant 1 : index
    %7 = memref.load %arg1[%c0_6, %c1_7] : memref<3x4xf32, #tpu.memory_space<smem>>
    %8 = vector.broadcast %7 : f32 to vector<1x128xf32>
    %9 = arith.mulf %6, %8 : vector<1x128xf32>
    %10 = arith.addf %4, %9 : vector<1x128xf32>
    %c2 = arith.constant 2 : index
    %c0_8 = arith.constant 0 : index
    %c0_9 = arith.constant 0 : index
    %11 = vector.load %arg3[%c2, %c0_8, %c0_9] : memref<4x1x128xf32, #tpu.memory_space<vmem>>, vector<1x1x128xf32>
    %12 = vector.shape_cast %11 : vector<1x1x128xf32> to vector<1x128xf32>
    %c0_10 = arith.constant 0 : index
    %c2_11 = arith.constant 2 : index
    %13 = memref.load %arg1[%c0_10, %c2_11] : memref<3x4xf32, #tpu.memory_space<smem>>
    %14 = vector.broadcast %13 : f32 to vector<1x128xf32>
    %15 = arith.mulf %12, %14 : vector<1x128xf32>
    %16 = arith.addf %10, %15 : vector<1x128xf32>
    %c3 = arith.constant 3 : index
    %c0_12 = arith.constant 0 : index
    %c0_13 = arith.constant 0 : index
    %17 = vector.load %arg3[%c3, %c0_12, %c0_13] : memref<4x1x128xf32, #tpu.memory_space<vmem>>, vector<1x1x128xf32>
    %18 = vector.shape_cast %17 : vector<1x1x128xf32> to vector<1x128xf32>
    %c0_14 = arith.constant 0 : index
    %c3_15 = arith.constant 3 : index
    %19 = memref.load %arg1[%c0_14, %c3_15] : memref<3x4xf32, #tpu.memory_space<smem>>
    %20 = vector.broadcast %19 : f32 to vector<1x128xf32>
    %21 = arith.mulf %18, %20 : vector<1x128xf32>
    %22 = arith.addf %16, %21 : vector<1x128xf32>
    %c0_16 = arith.constant 0 : index
    %23 = memref.load %arg2[%c0_16] : memref<3xf32, #tpu.memory_space<smem>>
    %24 = vector.broadcast %23 : f32 to vector<1x128xf32>
    %25 = arith.addf %22, %24 : vector<1x128xf32>
    %c0_17 = arith.constant 0 : index
    %c0_18 = arith.constant 0 : index
    %c0_19 = arith.constant 0 : index
    %26 = vector.load %arg4[%c0_17, %c0_18, %c0_19] : memref<3x1x128xf32, #tpu.memory_space<vmem>>, vector<1x1x128xf32>
    %27 = vector.shape_cast %26 : vector<1x1x128xf32> to vector<1x128xf32>
    %28 = vector.shape_cast %25 : vector<1x128xf32> to vector<1x1x128xf32>
    tpu.vector_store %arg4[%c0_17, %c0_18, %c0_19], %28 {strides = array<i32>} : memref<3x1x128xf32, #tpu.memory_space<vmem>>, vector<1x1x128xf32>,
    %c0_20 = arith.constant 0 : index
    %c0_21 = arith.constant 0 : index
    %c0_22 = arith.constant 0 : index
    %29 = vector.load %arg3[%c0_20, %c0_21, %c0_22] : memref<4x1x128xf32, #tpu.memory_space<vmem>>, vector<1x1x128xf32>
    %30 = vector.shape_cast %29 : vector<1x1x128xf32> to vector<1x128xf32>
    %c1_23 = arith.constant 1 : index
    %c0_24 = arith.constant 0 : index
    %31 = memref.load %arg1[%c1_23, %c0_24] : memref<3x4xf32, #tpu.memory_space<smem>>
    %32 = vector.broadcast %31 : f32 to vector<1x128xf32>
    %33 = arith.mulf %30, %32 : vector<1x128xf32>
    %c1_25 = arith.constant 1 : index
    %c0_26 = arith.constant 0 : index
    %c0_27 = arith.constant 0 : index
    %34 = vector.load %arg3[%c1_25, %c0_26, %c0_27] : memref<4x1x128xf32, #tpu.memory_space<vmem>>, vector<1x1x128xf32>
    %35 = vector.shape_cast %34 : vector<1x1x128xf32> to vector<1x128xf32>
    %c1_28 = arith.constant 1 : index
    %c1_29 = arith.constant 1 : index
    %36 = memref.load %arg1[%c1_28, %c1_29] : memref<3x4xf32, #tpu.memory_space<smem>>
    %37 = vector.broadcast %36 : f32 to vector<1x128xf32>
    %38 = arith.mulf %35, %37 : vector<1x128xf32>
    %39 = arith.addf %33, %38 : vector<1x128xf32>
    %c2_30 = arith.constant 2 : index
    %c0_31 = arith.constant 0 : index
    %c0_32 = arith.constant 0 : index
    %40 = vector.load %arg3[%c2_30, %c0_31, %c0_32] : memref<4x1x128xf32, #tpu.memory_space<vmem>>, vector<1x1x128xf32>
    %41 = vector.shape_cast %40 : vector<1x1x128xf32> to vector<1x128xf32>
    %c1_33 = arith.constant 1 : index
    %c2_34 = arith.constant 2 : index
    %42 = memref.load %arg1[%c1_33, %c2_34] : memref<3x4xf32, #tpu.memory_space<smem>>
    %43 = vector.broadcast %42 : f32 to vector<1x128xf32>
    %44 = arith.mulf %41, %43 : vector<1x128xf32>
    %45 = arith.addf %39, %44 : vector<1x128xf32>
    %c3_35 = arith.constant 3 : index
    %c0_36 = arith.constant 0 : index
    %c0_37 = arith.constant 0 : index
    %46 = vector.load %arg3[%c3_35, %c0_36, %c0_37] : memref<4x1x128xf32, #tpu.memory_space<vmem>>, vector<1x1x128xf32>
    %47 = vector.shape_cast %46 : vector<1x1x128xf32> to vector<1x128xf32>
    %c1_38 = arith.constant 1 : index
    %c3_39 = arith.constant 3 : index
    %48 = memref.load %arg1[%c1_38, %c3_39] : memref<3x4xf32, #tpu.memory_space<smem>>
    %49 = vector.broadcast %48 : f32 to vector<1x128xf32>
    %50 = arith.mulf %47, %49 : vector<1x128xf32>
    %51 = arith.addf %45, %50 : vector<1x128xf32>
    %c1_40 = arith.constant 1 : index
    %52 = memref.load %arg2[%c1_40] : memref<3xf32, #tpu.memory_space<smem>>
    %53 = vector.broadcast %52 : f32 to vector<1x128xf32>
    %54 = arith.addf %51, %53 : vector<1x128xf32>
    %c1_41 = arith.constant 1 : index
    %c0_42 = arith.constant 0 : index
    %c0_43 = arith.constant 0 : index
    %55 = vector.load %arg4[%c1_41, %c0_42, %c0_43] : memref<3x1x128xf32, #tpu.memory_space<vmem>>, vector<1x1x128xf32>
    %56 = vector.shape_cast %55 : vector<1x1x128xf32> to vector<1x128xf32>
    %57 = vector.shape_cast %54 : vector<1x128xf32> to vector<1x1x128xf32>
    tpu.vector_store %arg4[%c1_41, %c0_42, %c0_43], %57 {strides = array<i32>} : memref<3x1x128xf32, #tpu.memory_space<vmem>>, vector<1x1x128xf32>,
    %c0_44 = arith.constant 0 : index
    %c0_45 = arith.constant 0 : index
    %c0_46 = arith.constant 0 : index
    %58 = vector.load %arg3[%c0_44, %c0_45, %c0_46] : memref<4x1x128xf32, #tpu.memory_space<vmem>>, vector<1x1x128xf32>
    %59 = vector.shape_cast %58 : vector<1x1x128xf32> to vector<1x128xf32>
    %c2_47 = arith.constant 2 : index
    %c0_48 = arith.constant 0 : index
    %60 = memref.load %arg1[%c2_47, %c0_48] : memref<3x4xf32, #tpu.memory_space<smem>>
    %61 = vector.broadcast %60 : f32 to vector<1x128xf32>
    %62 = arith.mulf %59, %61 : vector<1x128xf32>
    %c1_49 = arith.constant 1 : index
    %c0_50 = arith.constant 0 : index
    %c0_51 = arith.constant 0 : index
    %63 = vector.load %arg3[%c1_49, %c0_50, %c0_51] : memref<4x1x128xf32, #tpu.memory_space<vmem>>, vector<1x1x128xf32>
    %64 = vector.shape_cast %63 : vector<1x1x128xf32> to vector<1x128xf32>
    %c2_52 = arith.constant 2 : index
    %c1_53 = arith.constant 1 : index
    %65 = memref.load %arg1[%c2_52, %c1_53] : memref<3x4xf32, #tpu.memory_space<smem>>
    %66 = vector.broadcast %65 : f32 to vector<1x128xf32>
    %67 = arith.mulf %64, %66 : vector<1x128xf32>
    %68 = arith.addf %62, %67 : vector<1x128xf32>
    %c2_54 = arith.constant 2 : index
    %c0_55 = arith.constant 0 : index
    %c0_56 = arith.constant 0 : index
    %69 = vector.load %arg3[%c2_54, %c0_55, %c0_56] : memref<4x1x128xf32, #tpu.memory_space<vmem>>, vector<1x1x128xf32>
    %70 = vector.shape_cast %69 : vector<1x1x128xf32> to vector<1x128xf32>
    %c2_57 = arith.constant 2 : index
    %c2_58 = arith.constant 2 : index
    %71 = memref.load %arg1[%c2_57, %c2_58] : memref<3x4xf32, #tpu.memory_space<smem>>
    %72 = vector.broadcast %71 : f32 to vector<1x128xf32>
    %73 = arith.mulf %70, %72 : vector<1x128xf32>
    %74 = arith.addf %68, %73 : vector<1x128xf32>
    %c3_59 = arith.constant 3 : index
    %c0_60 = arith.constant 0 : index
    %c0_61 = arith.constant 0 : index
    %75 = vector.load %arg3[%c3_59, %c0_60, %c0_61] : memref<4x1x128xf32, #tpu.memory_space<vmem>>, vector<1x1x128xf32>
    %76 = vector.shape_cast %75 : vector<1x1x128xf32> to vector<1x128xf32>
    %c2_62 = arith.constant 2 : index
    %c3_63 = arith.constant 3 : index
    %77 = memref.load %arg1[%c2_62, %c3_63] : memref<3x4xf32, #tpu.memory_space<smem>>
    %78 = vector.broadcast %77 : f32 to vector<1x128xf32>
    %79 = arith.mulf %76, %78 : vector<1x128xf32>
    %80 = arith.addf %74, %79 : vector<1x128xf32>
    %c2_64 = arith.constant 2 : index
    %81 = memref.load %arg2[%c2_64] : memref<3xf32, #tpu.memory_space<smem>>
    %82 = vector.broadcast %81 : f32 to vector<1x128xf32>
    %83 = arith.addf %80, %82 : vector<1x128xf32>
    %c2_65 = arith.constant 2 : index
    %c0_66 = arith.constant 0 : index
    %c0_67 = arith.constant 0 : index
    %84 = vector.load %arg4[%c2_65, %c0_66, %c0_67] : memref<3x1x128xf32, #tpu.memory_space<vmem>>, vector<1x1x128xf32>
    %85 = vector.shape_cast %84 : vector<1x1x128xf32> to vector<1x128xf32>
    %86 = vector.shape_cast %83 : vector<1x128xf32> to vector<1x1x128xf32>
    tpu.vector_store %arg4[%c2_65, %c0_66, %c0_67], %86 {strides = array<i32>} : memref<3x1x128xf32, #tpu.memory_space<vmem>>, vector<1x1x128xf32>,
    return
  }
  func.func @transform_0(%arg0: i32) -> (i32, i32) {
    %c0_i32 = arith.constant 0 : i32
    %c0_i32_0 = arith.constant 0 : i32
    %c0_i32_1 = arith.constant 0 : i32
    return %c0_i32, %c0_i32_0 : i32, i32
  }
  func.func @transform_1(%arg0: i32) -> i32 {
    %c0_i32 = arith.constant 0 : i32
    %c0_i32_0 = arith.constant 0 : i32
    return %c0_i32 : i32
  }
  func.func @transform_2(%arg0: i32) -> (i32, i32, i32) {
    %c0_i32 = arith.constant 0 : i32
    %c0_i32_0 = arith.constant 0 : i32
    %c0_i32_1 = arith.constant 0 : i32
    return %c0_i32, %arg0, %c0_i32_0 : i32, i32, i32
  }
  func.func @transform_3(%arg0: i32) -> (i32, i32, i32) {
    %c0_i32 = arith.constant 0 : i32
    %c0_i32_0 = arith.constant 0 : i32
    %c0_i32_1 = arith.constant 0 : i32
    return %c0_i32, %arg0, %c0_i32_0 : i32, i32, i32
  }
}

</mosaic_0001>

<bundles_post_ra>
// kernel: tpu_custom_call.1
= control target key start
LH: loop header
LB: loop body
LE: loop exit
PB: predicated region body
PF: predicated region fallthrough
CT: control target
= control target key end

     0   :  { %8 = vsyncpa [#allocation5], 0  ;;  %s282_s0 = inlined_call_operand.hbm [shape: f32[3,4], index: 0, kind: input, shape index: {}]   ;;  %s283_s1 = inlined_call_operand.vmem [shape: f32[3], index: 1, kind: input, shape index: {}]   ;;  %s284_s2 = inlined_call_operand.hbm [shape: f32[4,1,128], index: 2, kind: input, shape index: {}]   ;;  %s285_s3 = inlined_call_operand.hbm [shape: f32[3,1,128], index: 3, kind: output, shape index: {}]  }
   0x1   :  { %9 = vsyncpa [#allocation6], 0 }
   0x2   :  { %10 = vsyncpa [#allocation3], 0 }
   0x3   :  { %11 = vsyncpa [#allocation4], 0  ;;  %s26_s14 = sshll.u32 %s283_s1, 4  ;;  %s232_s15 = smov [#allocation2]   ;;  %s27_s14 = int_to_ptr.vmem [resolvable:$true] %s26_s14 }
   0x4   :  { %19 = dma.hbm_to_smem %s282_s0, 64, %s232_s15, [#allocation5]  }
   0x5   :  { %s172_s18 = scalar_lea.vmem %s27_s14, 16  ;;  %p177_p1 = scmp.lt.s32.totalorder %s27_s14, %s27_s14 }
   0x6   :  { %p173_p0 = scmp.ne.s32.totalorder %s27_s14, %s172_s18  ;;  %p178_p2 = scmp.lt.s32.totalorder %s172_s18, %s172_s18 }
   0x8   :  { %p179_p3 = por %p178_p2, %p177_p1 }
   0xa   :  { %p180_p4 = pnand %p179_p3, %p173_p0 }
   0xc   :  { %183 = shalt.err (!%p180_p4)
}
   0xd   :  { %s233_s19 = smov [#allocation7]   ;;  %s234_s20 = smov [#allocation8]  }
   0xe   :  { %29 = dma.vmem_to_smem %s27_s14, 16, %s233_s19, [#allocation6]  }
   0xf   :  { %s35_s21 = sshll.u32 %s234_s20, 4  ;;  %s36_s21 = int_to_ptr.vmem [resolvable:$true] %s35_s21 }
  0x10   :  { %s192_s22 = scalar_lea.vmem %s36_s21, 64  ;;  %p197_p6 = scmp.lt.s32.totalorder %s36_s21, %s36_s21 }
  0x11   :  { %p193_p5 = scmp.ne.s32.totalorder %s36_s21, %s192_s22  ;;  %p198_p7 = scmp.lt.s32.totalorder %s192_s22, %s192_s22 }
  0x13   :  { %p199_p8 = por %p198_p7, %p197_p6 }
  0x15   :  { %p200_p9 = pnand %p199_p8, %p193_p5 }
  0x17   :  { %203 = shalt.err (!%p200_p9)
}
  0x18   :  { %s235_s0 = smov 16   ;;  %s236_s1 = smov 1  }
  0x19   :  { %41 = dma.hbm_to_vmem [thread:$0]  %s284_s2, 64, %s36_s21, [#allocation3], %s235_s0, %s235_s0, %s236_s1  }
  0x1a   :  { %224 = dma.done.wait [#allocation5], 64  }
  0x1b   :  { %225 = vsyncadd [#allocation5], 4294967232 }
  0x1c   :  { %226 = dma.done.wait [#allocation6], 16  }
  0x1d   :  { %227 = vsyncadd [#allocation6], 4294967280 }
  0x1e   :  { %228 = dma.done.wait [#allocation3], 64  }
  0x1f   :  { %229 = vsyncadd [#allocation3], 4294967232 }
  0x20   :  { %51 = sfence }
  0x21   :  { %s53_s25 = sld [smem:[#allocation2]]  ;;  %v52_v0 = vld [vmem:[#allocation8] sm:$0x1]  ;;  %v57_v1 = vld [vmem:[#allocation8 + $0x1] sm:$0x1]  ;;  %s237_s12 = smov [#allocation9]  }
  0x22   :  { %s145_s26 = sld [smem:[#allocation2 + $0x1]]  ;;  %v63_v3 = vld [vmem:[#allocation8 + $0x2] sm:$0x1]  ;;  %v69_v6 = vld [vmem:[#allocation8 + $0x3] sm:$0x1]  ;;  %s131_s13 = sshll.u32 %s237_s12, 4  ;;  %s132_s13 = int_to_ptr.vmem [resolvable:$true] %s131_s13 }
  0x23   :  { %s146_s27 = sld [smem:[#allocation2 + $0x2]]  ;;  %v78_v11 = vld [vmem:[#allocation8] sm:$0x1]  ;;  %v82_v14 = vld [vmem:[#allocation8 + $0x1] sm:$0x1]  ;;  %s204_s14 = scalar_lea.vmem %s132_s13, 48 }
  0x24   :  { %s147_s28 = sld [smem:[#allocation2 + $0x3]]  ;;  %v87_v16 = vld [vmem:[#allocation8 + $0x2] sm:$0x1]  ;;  %v92_v20 = vld [vmem:[#allocation8 + $0x3] sm:$0x1]  ;;  %p205_p10 = scmp.ne.s32.totalorder %s132_s13, %s204_s14 }
  0x25   :  { %s270_s29 = sld [smem:[#allocation7]]  ;;  %v102_v27 = vld [vmem:[#allocation8] sm:$0x1]  ;;  %v106_v30 = vld [vmem:[#allocation8 + $0x1] sm:$0x1]  ;;  %s208_s15 = scalar_lea.vmem %s132_s13, 64 }
  0x26   :  { %s148_s30 = sld [smem:[#allocation2 + $0x80]]  ;;  %v111_v33 = vld [vmem:[#allocation8 + $0x2] sm:$0x1]  ;;  %v116_v37 = vld [vmem:[#allocation8 + $0x3] sm:$0x1]  ;;  %p209_p11 = scmp.lt.s32.totalorder %s132_s13, %s132_s13 }
  0x27   :  { %v54_v2 = vstv %s53_s25  ;;  %s149_s4 = sld [smem:[#allocation2 + $0x81]]  ;;  %p210_p12 = scmp.lt.s32.totalorder %s208_s15, %s204_s14 }
  0x28   :  { %v55_v4 = vmul.f32 %v54_v2, %v52_v0  ;;  %v59_v5 = vstv %s145_s26  ;;  %s150_s2 = sld [smem:[#allocation2 + $0x82]] }
  0x29   :  { %v60_v7 = vmul.f32 %v59_v5, %v57_v1  ;;  %v65_v8 = vstv %s146_s27  ;;  %s151_s5 = sld [smem:[#allocation2 + $0x83]]  ;;  %p211_p13 = por %p210_p12, %p209_p11 }
  0x2a   :  { %v66_v9 = vmul.f32 %v65_v8, %v63_v3  ;;  %v71_v10 = vstv %s147_s28  ;;  %s272_s6 = sld [smem:[#allocation7 + $0x1]] }
  0x2b   :  { %v61_v12 = vadd.f32 %v60_v7, %v55_v4  ;;  %v72_v13 = vmul.f32 %v71_v10, %v69_v6  ;;  %s153_s7 = sld [smem:[#allocation2 + $0x100]]  ;;  %v75_v21 = vstv %s270_s29  ;;  %p212_p0 = pnand %p211_p13, %p205_p10 }
  0x2c   :  { %v80_v15 = vstv %s148_s30  ;;  %s154_s8 = sld [smem:[#allocation2 + $0x101]] }
  0x2d   :  { %v67_v17 = vadd.f32 %v66_v9, %v61_v12  ;;  %v81_v18 = vmul.f32 %v80_v15, %v78_v11  ;;  %v84_v19 = vstv %s149_s4  ;;  %s155_s9 = sld [smem:[#allocation2 + $0x102]] }
  0x2e   :  { %v85_v22 = vmul.f32 %v84_v19, %v82_v14  ;;  %v89_v23 = vstv %s150_s2  ;;  %s156_s10 = sld [smem:[#allocation2 + $0x103]] }
  0x2f   :  { %v73_v24 = vadd.f32 %v72_v13, %v67_v17  ;;  %v90_v25 = vmul.f32 %v89_v23, %v87_v16  ;;  %v94_v26 = vstv %s151_s5  ;;  %s157_s11 = sld [smem:[#allocation7 + $0x2]] }
  0x30   :  { %v86_v28 = vadd.f32 %v85_v22, %v81_v18  ;;  %v95_v29 = vmul.f32 %v94_v26, %v92_v20  ;;  %v98_v38 = vstv %s272_s6 }
  0x31   :  { %v76_v31 = vadd.f32 %v75_v21, %v73_v24  ;;  %v104_v32 = vstv %s153_s7 }
  0x32   :  { %v91_v34 = vadd.f32 %v90_v25, %v86_v28  ;;  %v105_v35 = vmul.f32 %v104_v32, %v102_v27  ;;  %v108_v36 = vstv %s154_s8 }
  0x33   :  { %77 = vst [vmem:[#allocation9] sm:$0x1] %v76_v31  ;;  %v109_v39 = vmul.f32 %v108_v36, %v106_v30  ;;  %v113_v40 = vstv %s155_s9 }
  0x34   :  { %v96_v41 = vadd.f32 %v95_v29, %v91_v34  ;;  %v114_v42 = vmul.f32 %v113_v40, %v111_v33  ;;  %v118_v43 = vstv %s156_s10 }
  0x35   :  { %v110_v44 = vadd.f32 %v109_v39, %v105_v35  ;;  %v119_v45 = vmul.f32 %v118_v43, %v116_v37  ;;  %v122_v48 = vstv %s157_s11 }
  0x36   :  { %v99_v46 = vadd.f32 %v98_v38, %v96_v41 }
  0x37   :  { %v115_v47 = vadd.f32 %v114_v42, %v110_v44 }
  0x38   :  { %101 = vst [vmem:[#allocation9 + $0x1] sm:$0x1] %v99_v46 }
  0x39   :  { %v120_v49 = vadd.f32 %v119_v45, %v115_v47 }
  0x3b   :  { %v123_v50 = vadd.f32 %v122_v48, %v120_v49 }
  0x3d   :  { %125 = vst [vmem:[#allocation9 + $0x2] sm:$0x1] %v123_v50 }
  0x3e   :  { %215 = shalt.err (!%p212_p0)
}
  0x3f   :  { %137 = dma.vmem_to_hbm [thread:$0]  %s132_s13, 48, %s285_s3, [#allocation4], %s235_s0, %s235_s0, %s236_s1  }
  0x40   :  { %230 = dma.done.wait [#allocation4], 48  }
  0x41   :  { %231 = vsyncadd [#allocation4], 4294967248 }
  0x42   :  { %141 = vsyncpa [#allocation3], 1 }
  0x43   :  { %142 = vsyncpa [#allocation4], 1 }
  0x44   :  { %143 = vsyncpa [#allocation5], 1 }
  0x45   :  { %144 = vsyncpa [#allocation6], 1 }

</bundles_post_ra>
